<compile_context>
chip_gen: v6e
topology: v6e:2x2x1
jax: 0.10.0
libtpu: 0.0.40
codegen_flags: <defaults>
</compile_context>

<pallas_src>
import functools

import jax
import jax.numpy as jnp
from jax import lax
from jax.experimental import pallas as pl
from jax.experimental.pallas import tpu as pltpu


def _round_up(x, m):
    return ((x + m - 1) // m) * m


def pool_project_kernel(tok_ref, mask_ref, w_ref, b_ref, out_ref,
                        acc_sum, acc_cnt, *, s_total, s_tile, mask_ragged_s):
    """One (batch-tile, seq-chunk) grid step of masked mean pooling + Linear.

    pooled = sum_S(tok * mask) / clamp(sum_S(mask), min=1e-9)
    out    = pooled @ W + b          (only on the last seq chunk)
    """
    k = pl.program_id(1)

    @pl.when(k == 0)
    def _init():
        acc_sum[...] = jnp.zeros_like(acc_sum)
        acc_cnt[...] = jnp.zeros_like(acc_cnt)

    tok = tok_ref[...]        # (Bt, St, H)  streaming dtype
    mask = mask_ref[...]      # (Bt, St, 1)  in-lane broadcast over H

    # Multiply in the streaming dtype, accumulate in f32 (works on v5e too).
    masked = (tok * mask).astype(jnp.float32)      # (Bt, St, H)
    mask_f = mask.astype(jnp.float32)              # (Bt, St, 1)

    if mask_ragged_s:
        # Last seq chunk hangs past S: zero the out-of-range (unspecified,
        # possibly non-finite) rows before they reach the running sums.
        s_pos = k * s_tile + lax.broadcasted_iota(jnp.int32, (1, s_tile, 1), 1)
        valid = s_pos < s_total
        masked = jnp.where(valid, masked, 0.0)
        mask_f = jnp.where(valid, mask_f, 0.0)

    acc_sum[...] += jnp.sum(masked, axis=1)        # (Bt, H)  f32
    acc_cnt[...] += jnp.sum(mask_f, axis=1)        # (Bt, 1)  f32

    @pl.when(k == pl.num_programs(1) - 1)
    def _finalize():
        # Exact divide on a tiny (Bt, H) block; preserves torch.clamp(min=1e-9).
        denom = jnp.maximum(acc_cnt[...], 1e-9)
        pooled = acc_sum[...] / denom                                   # (Bt, H) f32
        out = jnp.dot(pooled.astype(w_ref.dtype), w_ref[...],
                      preferred_element_type=jnp.float32)               # MXU, (Bt, Dp)
        out_ref[...] = (out + b_ref[...]).astype(out_ref.dtype)


def get_sentence_embeddings_pallas(token_embeddings, attention_mask, w, b, *,
                                   b_tile=8, s_tile=256,
                                   mxu_dtype=jnp.bfloat16, stream_dtype=None):
    """Masked mean-pooling + Linear projection, tiled over (batch, sequence).

    stream_dtype=None streams the incoming dtype (no extra HBM pass).  Passing
    jnp.bfloat16 halves streamed bytes but adds a standalone cast pass unless it
    fuses into the producer, and deviates ~3 significant digits from f32.
    """
    B, S, H = token_embeddings.shape
    H_w, D = w.shape
    assert H_w == H

    # Streaming dtype: default = incoming dtype (no standalone cast pass).
    tok = token_embeddings if stream_dtype is None else token_embeddings.astype(stream_dtype)
    mask = attention_mask.astype(tok.dtype).reshape(B, S, 1)   # tiny vs [B,S,H]

    # Lane-dense projection dim: pads only the tiny weight / bias arrays.
    D_pad = _round_up(D, 128)
    w_p = jnp.pad(w.astype(mxu_dtype), ((0, 0), (0, D_pad - D)))
    b_p = jnp.pad(b.astype(jnp.float32).reshape(1, D), ((0, 0), (0, D_pad - D)))

    # Tiling: no padding of the big token tensor; Pallas handles ragged blocks.
    # Out block's 2nd-minor dim (B_tile) must be a multiple of 8 or equal B.
    B_tile = B if B <= max(b_tile, 8) else max(8, (b_tile // 8) * 8)
    S_tile = S if S <= max(s_tile, 8) else max(8, (s_tile // 8) * 8)
    grid = (pl.cdiv(B, B_tile), pl.cdiv(S, S_tile))
    mask_ragged_s = (S % S_tile) != 0

    # VMEM budget from actual buffer math (double-buffered inputs + resident
    # weights + output block + scratch + in-body f32 temporary + headroom),
    # capped at v7x's 64 MiB per-TC VMEM.
    itemsize = jnp.dtype(tok.dtype).itemsize
    tok_blk = B_tile * S_tile * H * itemsize
    mask_blk = B_tile * S_tile * itemsize
    w_bytes = H * D_pad * jnp.dtype(mxu_dtype).itemsize
    out_blk = B_tile * D_pad * 4
    acc_bytes = B_tile * H * 4 + B_tile * 4
    body_tmp = B_tile * S_tile * H * 4
    vmem_need = (2 * (tok_blk + mask_blk) + 2 * (w_bytes + D_pad * 4)
                 + 2 * out_blk + acc_bytes + body_tmp + (8 << 20))
    vmem_limit = int(min(max(vmem_need, 16 << 20), 64 << 20))

    cost = pl.CostEstimate(
        flops=int(2 * B * S * H + 2 * B * H * D_pad),
        transcendentals=0,
        bytes_accessed=int(tok.size * itemsize + mask.size * itemsize
                           + w_p.size * w_p.dtype.itemsize + b_p.size * 4
                           + B * D_pad * 4),
    )

    kernel = functools.partial(pool_project_kernel, s_total=S, s_tile=S_tile,
                               mask_ragged_s=mask_ragged_s)

    out = pl.pallas_call(
        kernel,
        out_shape=jax.ShapeDtypeStruct((B, D_pad), jnp.float32),
        grid_spec=pltpu.PrefetchScalarGridSpec(
            num_scalar_prefetch=0,
            grid=grid,
            in_specs=[
                # Streamed per (batch tile, seq chunk); double-buffered pipeline.
                pl.BlockSpec((B_tile, S_tile, H), lambda i, k: (i, k, 0)),
                pl.BlockSpec((B_tile, S_tile, 1), lambda i, k: (i, k, 0)),
                # Weights / bias stay resident across all grid steps.
                pl.BlockSpec((H, D_pad), lambda i, k: (0, 0)),
                pl.BlockSpec((1, D_pad), lambda i, k: (0, 0)),
            ],
            # Same output block across the seq (reduction) axis -> accumulator
            # pattern; written once in the last-k epilogue.
            out_specs=pl.BlockSpec((B_tile, D_pad), lambda i, k: (i, 0)),
            scratch_shapes=[
                pltpu.VMEM((B_tile, H), jnp.float32),   # acc_sum
                pltpu.VMEM((B_tile, 1), jnp.float32),   # acc_cnt
            ],
        ),
        compiler_params=pltpu.CompilerParams(
            # Batch tiles are independent -> megacore sharding on v7x;
            # seq axis carries the accumulator -> arbitrary.
            dimension_semantics=("parallel", "arbitrary"),
            vmem_limit_bytes=vmem_limit,
        ),
        cost_estimate=cost,
    )(tok, mask, w_p, b_p)

    # Drop the lane padding of the projection dim (ragged batch blocks were
    # clipped by Pallas on writeback, so no batch slicing is needed).
    return out[:, :D]


def reference(token_embeddings, attention_mask, w, b):
    """Exact f32 module math (mean_pooling + nn.Linear)."""
    tok = token_embeddings.astype(jnp.float32)
    mask = attention_mask.astype(jnp.float32)[:, :, None]
    pooled = (tok * mask).sum(axis=1) / jnp.maximum(mask.sum(axis=1), 1e-9)
    return pooled @ w.astype(jnp.float32) + b.astype(jnp.float32).reshape(1, -1)


def reference_mxu(token_embeddings, attention_mask, w, b, mxu_dtype):
    """Reference matching the kernel's native-MXU path (bf16 inputs, f32 acc)."""
    tok = token_embeddings.astype(jnp.float32)
    mask = attention_mask.astype(jnp.float32)[:, :, None]
    pooled = (tok * mask).sum(axis=1) / jnp.maximum(mask.sum(axis=1), 1e-9)
    out = jnp.dot(pooled.astype(mxu_dtype), w.astype(mxu_dtype),
                  preferred_element_type=jnp.float32)
    return out + b.astype(jnp.float32).reshape(1, -1)


if __name__ == "__main__":
    # Small stand-in shapes: 768 -> H=32, 50 -> D=16, max_length=100 -> S=8.
    B, S, H, D = 4, 8, 32, 16
    key = jax.random.PRNGKey(0)
    k_tok, k_len, k_w, k_concept, k_tok2, k_len2 = jax.random.split(key, 6)

    # Synthetic SciBERT last-hidden-state (model_output[0]) for the sentence nodes.
    token_embeddings = jax.random.normal(k_tok, (B, S, H), dtype=jnp.float32)

    # Attention mask: valid prefix of random length >= 1 per sentence.
    lengths = jax.random.randint(k_len, (B, 1), minval=1, maxval=S + 1)
    attention_mask = (jnp.arange(S)[None, :] < lengths).astype(jnp.float32)

    # Deterministic Linear(768, 50) analogue: m = nn.Linear(H, D).
    w = jax.random.normal(k_w, (H, D), dtype=jnp.float32) * 0.02
    b = jnp.zeros((1, D), dtype=jnp.float32)

    # Hot path in Pallas: masked mean-pooling + linear projection.
    sent_embs = get_sentence_embeddings_pallas(token_embeddings, attention_mask, w, b)
    sent_embs = jax.block_until_ready(sent_embs)

    # Glue matching forward(): concept-node embeddings come from the cuid2embs
    # pickle lookup (simulated), then everything is stacked into one [N, D] matrix.
    n_concepts = 3
    concept_embs = jax.random.normal(k_concept, (n_concepts, D), dtype=jnp.float32)
    node_embeddings = jnp.concatenate([concept_embs, sent_embs], axis=0)  # torch.stack analogue
    node_embeddings = jax.block_until_ready(node_embeddings)

    # TODO(synk): dgl.heterograph construction, pickle/tokenizer/SciBERT calls and
    # edge/node string filtering are host-side, non-tensor ops with no Pallas equivalent.

    # Validation 1: tight check against a reference that mirrors the kernel's
    # native-MXU (bf16-input, f32-accumulate) matmul path.
    ref_mxu = reference_mxu(token_embeddings, attention_mask, w, b, jnp.bfloat16)
    assert jnp.allclose(sent_embs, ref_mxu, atol=1e-3, rtol=1e-3), "mismatch vs MXU-path reference"

    # Validation 2: loose check against the exact f32 module math (documents the
    # small, intentional bf16-MXU deviation; pooling itself is exact f32).
    ref_f32 = reference(token_embeddings, attention_mask, w, b)
    assert jnp.allclose(sent_embs, ref_f32, atol=2e-2, rtol=2e-2), "mismatch vs exact f32 reference"

    # Validation 3: exercise the multi-chunk / ragged (batch and sequence) path.
    B2, S2 = 12, 20
    tok2 = jax.random.normal(k_tok2, (B2, S2, H), dtype=jnp.float32)
    lengths2 = jax.random.randint(k_len2, (B2, 1), minval=1, maxval=S2 + 1)
    mask2 = (jnp.arange(S2)[None, :] < lengths2).astype(jnp.float32)
    out2 = get_sentence_embeddings_pallas(tok2, mask2, w, b, b_tile=8, s_tile=8)
    out2 = jax.block_until_ready(out2)
    ref2 = reference_mxu(tok2, mask2, w, b, jnp.bfloat16)
    assert jnp.allclose(out2, ref2, atol=1e-3, rtol=1e-3), "mismatch on ragged multi-chunk path"

    assert node_embeddings.shape == (n_concepts + B, D)

    print("KERNEL_OK")
</pallas_src>

<mosaic_0001>
module attributes {stable_mosaic.version = 11 : i64} {
  func.func @pool_project_kernel(%arg0: i32, %arg1: i32, %arg2: memref<4x8x32xf32, #tpu.memory_space<vmem>>, %arg3: memref<4x8x1xf32, #tpu.memory_space<vmem>>, %arg4: memref<32x128xbf16, #tpu.memory_space<vmem>>, %arg5: memref<1x128xf32, #tpu.memory_space<vmem>>, %arg6: memref<4x128xf32, #tpu.memory_space<vmem>>, %arg7: memref<4x32xf32, #tpu.memory_space<vmem>>, %arg8: memref<4x1xf32, #tpu.memory_space<vmem>>) attributes {dimension_semantics = [#tpu.dimension_semantics<parallel>, #tpu.dimension_semantics<arbitrary>], iteration_bounds = array<i64: 1, 1>, scalar_prefetch = 0 : i64, scratch_operands = 2 : i64, tpu.core_type = #tpu.core_type<tc>, window_params = [{transform_indices = @transform_0, window_bounds = array<i64: 4, 8, 32>}, {transform_indices = @transform_1, window_bounds = array<i64: 4, 8, 1>}, {pipeline_mode = #tpu.pipeline_mode<synchronous>, transform_indices = @transform_2, window_bounds = array<i64: 32, 128>}, {pipeline_mode = #tpu.pipeline_mode<synchronous>, transform_indices = @transform_3, window_bounds = array<i64: 1, 128>}, {transform_indices = @transform_4, window_bounds = array<i64: 4, 128>}]} {
    %c0_i32 = arith.constant 0 : i32
    %0 = arith.cmpi eq, %arg1, %c0_i32 : i32
    %1 = arith.extui %0 : i1 to i32
    %c0_i32_0 = arith.constant 0 : i32
    %2 = arith.cmpi ne, %1, %c0_i32_0 : i32
    scf.if %2 {
      %cst_17 = arith.constant 0.000000e+00 : f32
      %18 = vector.broadcast %cst_17 : f32 to vector<4x32xf32>
      %c0_18 = arith.constant 0 : index
      %c0_19 = arith.constant 0 : index
      %19 = vector.load %arg7[%c0_18, %c0_19] : memref<4x32xf32, #tpu.memory_space<vmem>>, vector<4x32xf32>
      tpu.vector_store %arg7[%c0_18, %c0_19], %18 {strides = array<i32>} : memref<4x32xf32, #tpu.memory_space<vmem>>, vector<4x32xf32>,
      %cst_20 = arith.constant 0.000000e+00 : f32
      %20 = vector.broadcast %cst_20 : f32 to vector<4x1xf32>
      %c0_21 = arith.constant 0 : index
      %c0_22 = arith.constant 0 : index
      %21 = vector.load %arg8[%c0_21, %c0_22] : memref<4x1xf32, #tpu.memory_space<vmem>>, vector<4x1xf32>
      tpu.vector_store %arg8[%c0_21, %c0_22], %20 {strides = array<i32>} : memref<4x1xf32, #tpu.memory_space<vmem>>, vector<4x1xf32>,
    } else {
    }
    %c0 = arith.constant 0 : index
    %c0_1 = arith.constant 0 : index
    %c0_2 = arith.constant 0 : index
    %3 = vector.load %arg2[%c0, %c0_1, %c0_2] : memref<4x8x32xf32, #tpu.memory_space<vmem>>, vector<4x8x32xf32>
    %c0_3 = arith.constant 0 : index
    %c0_4 = arith.constant 0 : index
    %c0_5 = arith.constant 0 : index
    %4 = vector.load %arg3[%c0_3, %c0_4, %c0_5] : memref<4x8x1xf32, #tpu.memory_space<vmem>>, vector<4x8x1xf32>
    %5 = vector.broadcast %4 : vector<4x8x1xf32> to vector<4x8x32xf32>
    %6 = arith.mulf %3, %5 : vector<4x8x32xf32>
    %c0_6 = arith.constant 0 : index
    %c0_7 = arith.constant 0 : index
    %7 = vector.load %arg7[%c0_6, %c0_7] : memref<4x32xf32, #tpu.memory_space<vmem>>, vector<4x32xf32>
    %cst = arith.constant dense<0.000000e+00> : vector<4x32xf32>
    %8 = vector.multi_reduction <add>, %6, %cst [1] : vector<4x8x32xf32> to vector<4x32xf32>
    %9 = arith.addf %7, %8 : vector<4x32xf32>
    %c0_8 = arith.constant 0 : index
    %c0_9 = arith.constant 0 : index
    %10 = vector.load %arg7[%c0_8, %c0_9] : memref<4x32xf32, #tpu.memory_space<vmem>>, vector<4x32xf32>
    tpu.vector_store %arg7[%c0_8, %c0_9], %9 {strides = array<i32>} : memref<4x32xf32, #tpu.memory_space<vmem>>, vector<4x32xf32>,
    %c0_10 = arith.constant 0 : index
    %c0_11 = arith.constant 0 : index
    %11 = vector.load %arg8[%c0_10, %c0_11] : memref<4x1xf32, #tpu.memory_space<vmem>>, vector<4x1xf32>
    %cst_12 = arith.constant dense<0.000000e+00> : vector<4x1xf32>
    %12 = vector.multi_reduction <add>, %4, %cst_12 [1] : vector<4x8x1xf32> to vector<4x1xf32>
    %13 = arith.addf %11, %12 : vector<4x1xf32>
    %c0_13 = arith.constant 0 : index
    %c0_14 = arith.constant 0 : index
    %14 = vector.load %arg8[%c0_13, %c0_14] : memref<4x1xf32, #tpu.memory_space<vmem>>, vector<4x1xf32>
    tpu.vector_store %arg8[%c0_13, %c0_14], %13 {strides = array<i32>} : memref<4x1xf32, #tpu.memory_space<vmem>>, vector<4x1xf32>,
    %c0_i32_15 = arith.constant 0 : i32
    %15 = arith.cmpi eq, %arg1, %c0_i32_15 : i32
    %16 = arith.extui %15 : i1 to i32
    %c0_i32_16 = arith.constant 0 : i32
    %17 = arith.cmpi ne, %16, %c0_i32_16 : i32
    scf.if %17 {
      %c0_17 = arith.constant 0 : index
      %c0_18 = arith.constant 0 : index
      %18 = vector.load %arg8[%c0_17, %c0_18] : memref<4x1xf32, #tpu.memory_space<vmem>>, vector<4x1xf32>
      %cst_19 = arith.constant 9.99999971E-10 : f32
      %19 = vector.broadcast %cst_19 : f32 to vector<4x1xf32>
      %20 = arith.maximumf %18, %19 : vector<4x1xf32>
      %c0_20 = arith.constant 0 : index
      %c0_21 = arith.constant 0 : index
      %21 = vector.load %arg7[%c0_20, %c0_21] : memref<4x32xf32, #tpu.memory_space<vmem>>, vector<4x32xf32>
      %22 = vector.broadcast %20 : vector<4x1xf32> to vector<4x32xf32>
      %23 = arith.divf %21, %22 : vector<4x32xf32>
      %24 = arith.truncf %23 : vector<4x32xf32> to vector<4x32xbf16>
      %c0_22 = arith.constant 0 : index
      %c0_23 = arith.constant 0 : index
      %25 = vector.load %arg4[%c0_22, %c0_23] : memref<32x128xbf16, #tpu.memory_space<vmem>>, vector<32x128xbf16>
      %cst_24 = arith.constant dense<0.000000e+00> : vector<4x128xf32>
      %26 = tpu.matmul %24, %25, %cst_24 {dimension_numbers = #tpu.dot_dimension_numbers<[1], [0], [0], [1], [0, 0, 1, 1], [], []>} : vector<4x32xbf16>, vector<32x128xbf16>, vector<4x128xf32> -> vector<4x128xf32>
      %c0_25 = arith.constant 0 : index
      %c0_26 = arith.constant 0 : index
      %27 = vector.load %arg5[%c0_25, %c0_26] : memref<1x128xf32, #tpu.memory_space<vmem>>, vector<1x128xf32>
      %28 = vector.broadcast %27 : vector<1x128xf32> to vector<4x128xf32>
      %29 = arith.addf %26, %28 : vector<4x128xf32>
      %c0_27 = arith.constant 0 : index
      %c0_28 = arith.constant 0 : index
      %30 = vector.load %arg6[%c0_27, %c0_28] : memref<4x128xf32, #tpu.memory_space<vmem>>, vector<4x128xf32>
      tpu.vector_store %arg6[%c0_27, %c0_28], %29 {strides = array<i32>} : memref<4x128xf32, #tpu.memory_space<vmem>>, vector<4x128xf32>,
    } else {
    }
    return
  }
  func.func @transform_0(%arg0: i32, %arg1: i32) -> (i32, i32, i32) {
    %c0_i32 = arith.constant 0 : i32
    %c0_i32_0 = arith.constant 0 : i32
    return %arg0, %arg1, %c0_i32 : i32, i32, i32
  }
  func.func @transform_1(%arg0: i32, %arg1: i32) -> (i32, i32, i32) {
    %c0_i32 = arith.constant 0 : i32
    %c0_i32_0 = arith.constant 0 : i32
    return %arg0, %arg1, %c0_i32 : i32, i32, i32
  }
  func.func @transform_2(%arg0: i32, %arg1: i32) -> (i32, i32) {
    %c0_i32 = arith.constant 0 : i32
    %c0_i32_0 = arith.constant 0 : i32
    %c0_i32_1 = arith.constant 0 : i32
    return %c0_i32, %c0_i32_0 : i32, i32
  }
  func.func @transform_3(%arg0: i32, %arg1: i32) -> (i32, i32) {
    %c0_i32 = arith.constant 0 : i32
    %c0_i32_0 = arith.constant 0 : i32
    %c0_i32_1 = arith.constant 0 : i32
    return %c0_i32, %c0_i32_0 : i32, i32
  }
  func.func @transform_4(%arg0: i32, %arg1: i32) -> (i32, i32) {
    %c0_i32 = arith.constant 0 : i32
    %c0_i32_0 = arith.constant 0 : i32
    return %arg0, %c0_i32 : i32, i32
  }
}

</mosaic_0001>

<bundles_post_ra>
// kernel: tpu_custom_call.1
= control target key start
LH: loop header
LB: loop body
LE: loop exit
PB: predicated region body
PF: predicated region fallthrough
CT: control target
= control target key end

     0   :  { %9 = vsyncpa [#allocation5], 0  ;;  %s406_s0 = inlined_call_operand.vmem [shape: f32[4,8,32], index: 0, kind: input, shape index: {}]   ;;  %s407_s1 = inlined_call_operand.vmem [shape: f32[4,8,1], index: 1, kind: input, shape index: {}]   ;;  %s408_s2 = inlined_call_operand.hbm [shape: bf16[32,128], index: 2, kind: input, shape index: {}]   ;;  %s409_s3 = inlined_call_operand.vmem [shape: f32[1,128], index: 3, kind: input, shape index: {}]   ;;  %s410_s4 = inlined_call_operand.hbm [shape: f32[4,128], index: 4, kind: output, shape index: {}]  }
   0x1   :  { %10 = vsyncpa [#allocation6], 0  ;;  %s326_s15 = smov [#allocation4]  }
   0x2   :  { %s20_s16 = sshll.u32 %s326_s15, 4  ;;  %s21_s16 = int_to_ptr.vmem [resolvable:$true] %s20_s16 }
   0x3   :  { %s290_s17 = scalar_lea.vmem %s21_s16, 256  ;;  %p295_p1 = scmp.lt.s32.totalorder %s21_s16, %s21_s16 }
   0x4   :  { %p291_p0 = scmp.ne.s32.totalorder %s21_s16, %s290_s17  ;;  %p296_p2 = scmp.lt.s32.totalorder %s290_s17, %s290_s17 }
   0x6   :  { %p297_p3 = por %p296_p2, %p295_p1 }
   0x8   :  { %p298_p4 = pnand %p297_p3, %p291_p0 }
   0xa   :  { %301 = shalt.err (!%p298_p4)
}
   0xb   :  { %s327_s18 = smov 64   ;;  %s328_s19 = smov 4  }
   0xc   :  { %26 = dma.hbm_to_vmem [thread:$0]  %s408_s2, 256, %s21_s16, [#allocation5], %s327_s18, %s327_s18, %s328_s19  }
   0xd   :  { %322 = dma.done.wait [#allocation5], 256  }
   0xe   :  { %323 = vsyncadd [#allocation5], 4294967040  ;;  %v329_v0 = vmov 0   ;;  %vm39_vm0 = vcmask 3072   ;;  %v330_v1 = vmov 0.0   ;;  %vm118_vm1 = vcmask 7168  }
   0xf   :  { %276 = vset.pattern.permute.xlu0 %v329_v0  ;;  %277 = vset.pattern.permute.xlu1 %v329_v0  ;;  %40 = vst.msk [vmem:[#allocation3] sm:$0xf] %vm39_vm0, %v330_v1  ;;  %v45_v2 = vld [vmem:[%s407_s1] sm:$0xff]  ;;  %v47_v3 = vld [vmem:[%s407_s1 + $0x10] sm:$0xff]  ;;  %v46_v4 = vld [vmem:[%s407_s1 + $0x8] sm:$0xff]  ;;  %vm37_vm2 = vcmask 257024  }
  0x10   :  { %261 = vmatprep.subr.bf16.mxu0 %v330_v1  ;;  %51 = vperm.xlu0 %276, %v45_v2   ;;  %v119_v5 = vsel %vm118_vm1, %v45_v2, 0.0  ;;  %v133_v6 = vsel %vm118_vm1, %v47_v3, 0.0  ;;  %v126_v7 = vsel %vm118_vm1, %v46_v4, 0.0  ;;  %v48_v8 = vld [vmem:[%s407_s1 + $0x18] sm:$0xff]  ;;  %vm107_vm3 = vcmask 1041409   ;;  %v278_v39 = vld [vmem:[#allocation4 + $0x8] sm:$0xff]  }
  0x11   :  { %61 = vperm.xlu1 %277, %v47_v3   ;;  %v120_v9 = vrot.slane %v119_v5, 4  ;;  %v134_v10 = vrot.slane %v133_v6, 4  ;;  %v127_v11 = vrot.slane %v126_v7, 4  ;;  %v140_v12 = vsel %vm118_vm1, %v48_v8, 0.0  ;;  %38 = vst.msk [vmem:[#allocation2] sm:$0xf] %vm37_vm2, %v330_v1  ;;  %262 = vmatpush3.bf16.msra.mxu0 %v278_v39 }
  0x12   :  { %v141_v13 = vrot.slane %v140_v12, 4  ;;  %vm109_vm4 = vcmask 1042434   ;;  %vm111_vm5 = vcmask 1043459   ;;  %vm331_vm6 = vmmov 0   ;;  %v279_v42 = vld [vmem:[#allocation4] sm:$0xff]   ;;  %263 = vmatprep.subr.bf16.mxu0 %v330_v1  ;;  %v41_v43 = vld [vmem:[%s406_s0] sm:$0xff] }
  0x13   :  { %v121_v14 = vadd.f32 %v120_v9, %v119_v5  ;;  %v135_v15 = vadd.f32 %v134_v10, %v133_v6  ;;  %v128_v16 = vadd.f32 %v127_v11, %v126_v7  ;;  %265 = vmatprep.mubr.msk.bf16.mxu0 %vm331_vm6, %v330_v1  ;;  %v43_v44 = vld [vmem:[%s406_s0 + $0x10] sm:$0xff]  ;;  %vm74_vm7 = vcmask 261120   ;;  %v42_v49 = vld [vmem:[%s406_s0 + $0x8] sm:$0xff]  ;;  %v44_v50 = vld [vmem:[%s406_s0 + $0x18] sm:$0xff]  ;;  %s332_s11 = smov [#allocation7]  }
  0x14   :  { %56 = vperm.xlu0 %276, %v46_v4   ;;  %v142_v17 = vadd.f32 %v141_v13, %v140_v12  ;;  %s245_s12 = sshll.u32 %s332_s11, 4  ;;  %s246_s12 = int_to_ptr.vmem [resolvable:$true] %s245_s12 }
  0x15   :  { %66 = vperm.xlu1 %277, %v48_v8   ;;  %v122_v18 = vrot.slane %v121_v14, 2  ;;  %v136_v19 = vrot.slane %v135_v15, 2  ;;  %v129_v20 = vrot.slane %v128_v16, 2  ;;  %264 = vmatpush3.bf16.msra.mxu0 %v279_v42  ;;  %s302_s13 = scalar_lea.vmem %s246_s12, 64  ;;  %p307_p6 = scmp.lt.s32.totalorder %s246_s12, %s246_s12 }
  0x16   :  { %v143_v21 = vrot.slane %v142_v17, 2  ;;  %v117_v35 = vld [vmem:[#allocation3] sm:$0xf]  ;;  %p303_p5 = scmp.ne.s32.totalorder %s246_s12, %s302_s13  ;;  %p308_p7 = scmp.lt.s32.totalorder %s302_s13, %s302_s13 }
  0x17   :  { %v123_v22 = vadd.f32 %v122_v18, %v121_v14  ;;  %v137_v23 = vadd.f32 %v136_v19, %v135_v15  ;;  %v130_v24 = vadd.f32 %v129_v20, %v128_v16 }
  0x18   :  { %v144_v25 = vadd.f32 %v143_v21, %v142_v17  ;;  %v73_v20 = vld [vmem:[#allocation2] sm:$0xf]  ;;  %p309_p8 = por %p308_p7, %p307_p6 }
  0x19   :  { %v124_v26 = vrot.slane %v123_v22, 1  ;;  %v138_v27 = vrot.slane %v137_v23, 1  ;;  %v131_v28 = vrot.slane %v130_v24, 1 }
  0x1a   :  { %v145_v29 = vrot.slane %v144_v25, 1  ;;  %p310_p9 = pnand %p309_p8, %p303_p5 }
  0x1b   :  { %v125_v30 = vadd.f32 %v124_v26, %v123_v22  ;;  %v139_v31 = vadd.f32 %v138_v27, %v137_v23  ;;  %v132_v32 = vadd.f32 %v131_v28, %v130_v24 }
  0x1c   :  { %v146_v33 = vadd.f32 %v145_v29, %v144_v25  ;;  %v254_v29 = vld [vmem:[%s409_s3] ss:$0 sm:$0xff] }
  0x1d   :  { %v151_v34 = vsel %vm107_vm3, %v132_v32, %v125_v30 }
  0x1e   :  { %v152_v36 = vsel %vm109_vm4, %v139_v31, %v151_v34 }
  0x1f   :  { %v153_v37 = vsel %vm111_vm5, %v146_v33, %v152_v36 }
  0x20   :  { %v155_v38 = vadd.f32 %v153_v37, %v117_v35 }
  0x22   :  { %157 = vst.msk [vmem:[#allocation3] sm:$0xf] %vm39_vm0, %v155_v38 }
  0x29   :  { %v161_v40 = vld [vmem:[#allocation3] sm:$0xf] }
  0x2a   :  { %v162_v41 = vmax.f32 %v161_v40, 1e-09 }
  0x2c   :  { %166 = vperm.xlu0 %276, %v162_v41  }
  0x8b   :  { %v52_v45 = vpop.permute.xlu0 %51 }
  0x8c   :  { %v62_v46 = vpop.permute.xlu1 %61  ;;  %v69_v47 = vmul.f32 %v52_v45, %v41_v43 }
  0x8d   :  { %v71_v48 = vmul.f32 %v62_v46, %v43_v44 }
  0x8e   :  { %v75_v51 = vsel %vm74_vm7, %v69_v47, 0.0 }
  0x8f   :  { %v89_v52 = vsel %vm74_vm7, %v71_v48, 0.0  ;;  %v76_v53 = vrot.slane %v75_v51, 4  ;;  %v57_v55 = vpop.permute.xlu0 %56 }
  0x90   :  { %v90_v54 = vrot.slane %v89_v52, 4  ;;  %v67_v56 = vpop.permute.xlu1 %66  ;;  %v70_v57 = vmul.f32 %v57_v55, %v42_v49 }
  0x91   :  { %v72_v58 = vmul.f32 %v67_v56, %v44_v50  ;;  %v77_v59 = vadd.f32 %v76_v53, %v75_v51 }
  0x92   :  { %v91_v60 = vadd.f32 %v90_v54, %v89_v52  ;;  %v82_v61 = vsel %vm74_vm7, %v70_v57, 0.0 }
  0x93   :  { %v96_v62 = vsel %vm74_vm7, %v72_v58, 0.0  ;;  %v78_v63 = vrot.slane %v77_v59, 2  ;;  %v83_v1 = vrot.slane %v82_v61, 4 }
  0x94   :  { %v92_v0 = vrot.slane %v91_v60, 2  ;;  %v97_v2 = vrot.slane %v96_v62, 4 }
  0x95   :  { %v79_v3 = vadd.f32 %v78_v63, %v77_v59  ;;  %v84_v5 = vadd.f32 %v83_v1, %v82_v61 }
  0x96   :  { %v93_v4 = vadd.f32 %v92_v0, %v91_v60  ;;  %v98_v6 = vadd.f32 %v97_v2, %v96_v62 }
  0x97   :  { %v80_v7 = vrot.slane %v79_v3, 1  ;;  %v85_v8 = vrot.slane %v84_v5, 2 }
  0x98   :  { %v99_v9 = vrot.slane %v98_v6, 2  ;;  %v94_v10 = vrot.slane %v93_v4, 1 }
  0x99   :  { %v86_v11 = vadd.f32 %v85_v8, %v84_v5  ;;  %v81_v13 = vadd.f32 %v80_v7, %v79_v3 }
  0x9a   :  { %v100_v12 = vadd.f32 %v99_v9, %v98_v6  ;;  %v95_v16 = vadd.f32 %v94_v10, %v93_v4 }
  0x9b   :  { %v87_v14 = vrot.slane %v86_v11, 1 }
  0x9c   :  { %v101_v15 = vrot.slane %v100_v12, 1 }
  0x9d   :  { %v88_v17 = vadd.f32 %v87_v14, %v86_v11 }
  0x9e   :  { %v102_v18 = vadd.f32 %v101_v15, %v100_v12 }
  0x9f   :  { %v108_v19 = vsel %vm107_vm3, %v88_v17, %v81_v13 }
  0xa0   :  { %v110_v21 = vsel %vm109_vm4, %v95_v16, %v108_v19 }
  0xa1   :  { %v112_v22 = vsel %vm111_vm5, %v102_v18, %v110_v21 }
  0xa2   :  { %v114_v23 = vadd.f32 %v112_v22, %v73_v20 }
  0xa4   :  { %116 = vst.msk [vmem:[#allocation2] sm:$0xf] %vm37_vm2, %v114_v23 }
  0xa7   :  { %v167_v24 = vpop.permute.xlu0 %166 }
  0xa8   :  { %280 = vrcp.f32 %v167_v24 }
  0xab   :  { %v163_v26 = vld [vmem:[#allocation2] sm:$0xf] }
  0xb5   :  { %v281_v25 = vpop.eup %280 }
  0xb6   :  { %v170_v27 = vmul.f32 %v281_v25, %v163_v26 }
  0xb8   :  { %v171_v28 = vpack.c.bf16 %v170_v27, %v170_v27 }
  0xba   :  { %266 = vmatmul.mubr.msk.bf16.vlgmr.msra.gmra.mxu0 %vm74_vm7, %v171_v28 }
 0x17a   :  { %v232_v30 = vpop.f32.mrf.mxu0 }
 0x17b   :  { %v233_v31 = vadd.f32 %v254_v29, %v232_v30 }
 0x17c   :  { %v267_v32 = vpop.f32.mrf.mxu0 }
 0x17d   :  { %238 = vst [vmem:[#allocation7] sm:$0xf] %v233_v31 }
 0x17e   :  { %v235_v33 = vpop.f32.mrf.mxu0 }
 0x17f   :  { %313 = shalt.err (!%p310_p9)
}
 0x180   :  { %248 = dma.vmem_to_hbm [thread:$0]  %s246_s12, 64, %s410_s4, [#allocation6]   ;;  %v268_v34 = vpop.f32.mrf.mxu0 }
 0x181   :  { %324 = dma.done.wait [#allocation6], 64  }
 0x182   :  { %325 = vsyncadd [#allocation6], 4294967232 }
 0x183   :  { %252 = vsyncpa [#allocation5], 1 }
 0x184   :  { %253 = vsyncpa [#allocation6], 1 }

</bundles_post_ra>
